<compile_context>
chip_gen: v5e
topology: v5e:2x2
jax: 0.10.0
libtpu: 0.0.40
codegen_flags: <defaults>
</compile_context>

<pallas_src>
import functools

import jax
import jax.numpy as jnp
from jax.experimental import pallas as pl
from jax.experimental.pallas import tpu as pltpu

LANE = 128  # hidden feature dims are zero-padded up to this many lanes


def _round_up(n, m):
    return ((n + m - 1) // m) * m


def _sigmoid(z):
    # Single EUP transcendental (tanh); the mul/adds ride the VALU slack.
    return 0.5 * (jnp.tanh(0.5 * z) + 1.0)


def _forward_block(x, w1, b1, w2, b2, w3_row, b3):
    # x: (tb, in_features); w1: (in_features, 128); w2: (128, 128);
    # w3_row: (1, 128) (single output neuron laid along lanes); b3: (1, 1).
    h1 = _sigmoid(jnp.dot(x, w1, preferred_element_type=jnp.float32) + b1)
    h2 = _sigmoid(jnp.dot(h1.astype(w2.dtype), w2,
                          preferred_element_type=jnp.float32) + b2)
    # Layer 3: 1 output neuron -> VPU multiply + XLU lane reduction (no N=1 MXU op).
    z3 = jnp.sum(h2 * w3_row, axis=1, keepdims=True) + b3
    return _sigmoid(z3)  # (tb, 1) f32


# ----------------------------------------------------------------------------
# Kernels
# ----------------------------------------------------------------------------
def mlp_fwd_kernel(x_ref, w1_ref, b1_ref, w2_ref, b2_ref, w3_ref, b3_ref, o_ref):
    o_ref[...] = _forward_block(
        x_ref[...], w1_ref[...], b1_ref[...], w2_ref[...], b2_ref[...],
        w3_ref[...], b3_ref[...]).astype(o_ref.dtype)


def mlp_fused_kernel(x_ref, w1_ref, b1_ref, w2_ref, b2_ref, w3_ref, b3_ref,
                     y_ref, pred_ref, part_ref, *, n_valid):
    # Emits predictions AND a per-tile partial sum of squared error (lane-dense
    # (8,128) slab; wrapper reads [0,0]).  Grid axis is fully "parallel".
    i = pl.program_id(0)
    tb = x_ref.shape[0]

    pred = _forward_block(
        x_ref[...], w1_ref[...], b1_ref[...], w2_ref[...], b2_ref[...],
        w3_ref[...], b3_ref[...])                       # (tb, 1) f32
    pred_ref[...] = pred.astype(pred_ref.dtype)

    # Mask rows beyond the real batch (only relevant for the last ragged tile).
    row = jax.lax.broadcasted_iota(jnp.int32, pred.shape, 0) + i * tb
    d = jnp.where(row < n_valid, pred - y_ref[...], 0.0)
    part_ref[...] = jnp.full(part_ref.shape, jnp.sum(d * d), jnp.float32)


# ----------------------------------------------------------------------------
# Parameter prep / wrappers
# ----------------------------------------------------------------------------
def _pad2(a, rows, cols):
    return jnp.zeros((rows, cols), a.dtype).at[:a.shape[0], :a.shape[1]].set(a)


def _pad_rows(a, padded_rows):
    if a.shape[0] == padded_rows:
        return a
    return jnp.zeros((padded_rows,) + a.shape[1:], a.dtype).at[:a.shape[0]].set(a)


def pad_params(params, weight_dtype=jnp.float32):
    """Zero-pad hidden feature dims to 128 lanes. x's input dim and the output
    dim stay at their real sizes. Optionally store the big weights in bf16."""
    w1, b1, w2, b2, w3, b3 = params
    d_h1 = _round_up(w1.shape[1], LANE)       # 64 -> 128
    d_h2 = _round_up(w2.shape[1], LANE)       # 32 -> 128
    return (
        _pad2(w1, w1.shape[0], d_h1).astype(weight_dtype),   # (in, 128)
        _pad2(b1, 1, d_h1),                                   # (1, 128) f32
        _pad2(w2, d_h1, d_h2).astype(weight_dtype),           # (128, 128)
        _pad2(b2, 1, d_h2),                                   # (1, 128) f32
        _pad2(w3.T, 1, d_h2),                                  # (1, 128) f32 row
        b3,                                                    # (1, 1)   f32
    )


def _tiling(batch, block_batch):
    tb = min(block_batch, _round_up(batch, 8))
    padded_batch = _round_up(batch, tb)
    return tb, padded_batch


def mlp_forward(x, padded_params, *, block_batch=2048):
    w1, b1, w2, b2, w3, b3 = padded_params
    batch, in_features = x.shape
    tb, padded_batch = _tiling(batch, block_batch)
    x_in = _pad_rows(x.astype(w1.dtype), padded_batch)

    const = lambda i: (0, 0)
    out = pl.pallas_call(
        mlp_fwd_kernel,
        out_shape=jax.ShapeDtypeStruct((padded_batch, 1), jnp.float32),
        grid_spec=pltpu.PrefetchScalarGridSpec(
            num_scalar_prefetch=0,
            grid=(padded_batch // tb,),
            in_specs=[
                pl.BlockSpec((tb, in_features), lambda i: (i, 0)),
                pl.BlockSpec(w1.shape, const),
                pl.BlockSpec(b1.shape, const),
                pl.BlockSpec(w2.shape, const),
                pl.BlockSpec(b2.shape, const),
                pl.BlockSpec(w3.shape, const),
                pl.BlockSpec(b3.shape, const),
            ],
            out_specs=pl.BlockSpec((tb, 1), lambda i: (i, 0)),
        ),
        compiler_params=pltpu.CompilerParams(
            dimension_semantics=("parallel",)),
    )(x_in, w1, b1, w2, b2, w3, b3)
    return out[:batch]


def mlp_forward_and_loss(x, y, padded_params, *, block_batch=2048):
    """Fused forward + MSE loss in one pallas_call. Returns (y_pred, loss)."""
    w1, b1, w2, b2, w3, b3 = padded_params
    batch, in_features = x.shape
    tb, padded_batch = _tiling(batch, block_batch)
    grid = padded_batch // tb
    x_in = _pad_rows(x.astype(w1.dtype), padded_batch)
    y_in = _pad_rows(y.astype(jnp.float32), padded_batch)

    const = lambda i: (0, 0)
    kernel = functools.partial(mlp_fused_kernel, n_valid=batch)
    pred, partials = pl.pallas_call(
        kernel,
        out_shape=(
            jax.ShapeDtypeStruct((padded_batch, 1), jnp.float32),
            jax.ShapeDtypeStruct((grid, 8, 128), jnp.float32),
        ),
        grid_spec=pltpu.PrefetchScalarGridSpec(
            num_scalar_prefetch=0,
            grid=(grid,),
            in_specs=[
                pl.BlockSpec((tb, in_features), lambda i: (i, 0)),
                pl.BlockSpec(w1.shape, const),
                pl.BlockSpec(b1.shape, const),
                pl.BlockSpec(w2.shape, const),
                pl.BlockSpec(b2.shape, const),
                pl.BlockSpec(w3.shape, const),
                pl.BlockSpec(b3.shape, const),
                pl.BlockSpec((tb, 1), lambda i: (i, 0)),
            ],
            out_specs=[
                pl.BlockSpec((tb, 1), lambda i: (i, 0)),
                pl.BlockSpec((1, 8, 128), lambda i: (i, 0, 0)),
            ],
        ),
        compiler_params=pltpu.CompilerParams(
            dimension_semantics=("parallel",)),   # per-tile partials -> both TCs on v7x
    )(x_in, w1, b1, w2, b2, w3, b3, y_in)

    loss = jnp.sum(partials[:, 0, 0]) / jnp.float32(batch)
    return pred[:batch], loss


def mlp_loss(x, y, padded_params, **kw):
    """Matches TorchModule.forward(x, y): returns only the scalar MSE loss."""
    return mlp_forward_and_loss(x, y, padded_params, **kw)[1]


# ----------------------------------------------------------------------------
# Reference / init
# ----------------------------------------------------------------------------
def init_params(key, input_size, hidden_size1, hidden_size2):
    """nn.Linear-style init (uniform +/- 1/sqrt(fan_in)); weights stored (in, out)."""
    ks = jax.random.split(key, 6)

    def lin(kw, kb, fan_in, fan_out):
        bound = 1.0 / jnp.sqrt(fan_in)
        w = jax.random.uniform(kw, (fan_in, fan_out), jnp.float32, -bound, bound)
        b = jax.random.uniform(kb, (1, fan_out), jnp.float32, -bound, bound)
        return w, b

    w1, b1 = lin(ks[0], ks[1], input_size, hidden_size1)
    w2, b2 = lin(ks[2], ks[3], hidden_size1, hidden_size2)
    w3, b3 = lin(ks[4], ks[5], hidden_size2, 1)
    return (w1, b1, w2, b2, w3, b3)


def reference_forward(x, params):
    w1, b1, w2, b2, w3, b3 = params
    h1 = jax.nn.sigmoid(x @ w1 + b1)
    h2 = jax.nn.sigmoid(h1 @ w2 + b2)
    return jax.nn.sigmoid(h2 @ w3 + b3)


if __name__ == "__main__":
    input_size, hidden_size1, hidden_size2 = 32, 64, 32

    key = jax.random.PRNGKey(0)
    k_params, k_data = jax.random.split(key)
    params = init_params(k_params, input_size, hidden_size1, hidden_size2)
    padded = pad_params(params)  # f32 for exactness; pass jnp.bfloat16 for v6e/v7x traffic savings

    for batch in (8, 13):  # 13 exercises the ragged-tile / row-mask path
        kx, ky = jax.random.split(jax.random.fold_in(k_data, batch))
        x = jax.random.normal(kx, (batch, input_size), jnp.float32)
        y = jax.random.uniform(ky, (batch, 1), jnp.float32)

        # forward with no labels -> predictions
        y_pred = mlp_forward(x, padded)
        jax.block_until_ready(y_pred)

        # forward with labels -> scalar MSE loss (fused kernel, module semantics)
        loss = mlp_loss(x, y, padded)
        jax.block_until_ready(loss)

        # fused path also exposes both outputs in one call
        y_pred2, loss2 = mlp_forward_and_loss(x, y, padded)
        jax.block_until_ready(loss2)

        ref_pred = reference_forward(x, params)
        ref_loss = jnp.mean((ref_pred - y) ** 2)
        assert y_pred.shape == (batch, 1), f"bad output shape @ batch={batch}"
        assert jnp.allclose(y_pred, ref_pred, atol=1e-4, rtol=1e-4), f"pred mismatch @ batch={batch}"
        assert jnp.allclose(y_pred2, ref_pred, atol=1e-4, rtol=1e-4), f"fused pred mismatch @ batch={batch}"
        assert jnp.allclose(loss, ref_loss, atol=1e-4, rtol=1e-4), f"loss mismatch @ batch={batch}"
        assert jnp.allclose(loss2, ref_loss, atol=1e-4, rtol=1e-4), f"fused loss mismatch @ batch={batch}"

    print("KERNEL_OK")
</pallas_src>

<mosaic_0001>
module attributes {stable_mosaic.version = 11 : i64} {
  func.func @mlp_fwd_kernel(%arg0: i32, %arg1: memref<8x32xf32, #tpu.memory_space<vmem>>, %arg2: memref<32x128xf32, #tpu.memory_space<vmem>>, %arg3: memref<1x128xf32, #tpu.memory_space<vmem>>, %arg4: memref<128x128xf32, #tpu.memory_space<vmem>>, %arg5: memref<1x128xf32, #tpu.memory_space<vmem>>, %arg6: memref<1x128xf32, #tpu.memory_space<vmem>>, %arg7: memref<1x1xf32, #tpu.memory_space<vmem>>, %arg8: memref<8x1xf32, #tpu.memory_space<vmem>>) attributes {dimension_semantics = [#tpu.dimension_semantics<parallel>], iteration_bounds = array<i64: 1>, scalar_prefetch = 0 : i64, scratch_operands = 0 : i64, tpu.core_type = #tpu.core_type<tc>, window_params = [{transform_indices = @transform_0, window_bounds = array<i64: 8, 32>}, {pipeline_mode = #tpu.pipeline_mode<synchronous>, transform_indices = @transform_1, window_bounds = array<i64: 32, 128>}, {pipeline_mode = #tpu.pipeline_mode<synchronous>, transform_indices = @transform_2, window_bounds = array<i64: 1, 128>}, {pipeline_mode = #tpu.pipeline_mode<synchronous>, transform_indices = @transform_3, window_bounds = array<i64: 128, 128>}, {pipeline_mode = #tpu.pipeline_mode<synchronous>, transform_indices = @transform_4, window_bounds = array<i64: 1, 128>}, {pipeline_mode = #tpu.pipeline_mode<synchronous>, transform_indices = @transform_5, window_bounds = array<i64: 1, 128>}, {pipeline_mode = #tpu.pipeline_mode<synchronous>, transform_indices = @transform_6, window_bounds = array<i64: 1, 1>}, {transform_indices = @transform_7, window_bounds = array<i64: 8, 1>}]} {
    %c0 = arith.constant 0 : index
    %c0_0 = arith.constant 0 : index
    %0 = vector.load %arg1[%c0, %c0_0] : memref<8x32xf32, #tpu.memory_space<vmem>>, vector<8x32xf32>
    %c0_1 = arith.constant 0 : index
    %c0_2 = arith.constant 0 : index
    %1 = vector.load %arg2[%c0_1, %c0_2] : memref<32x128xf32, #tpu.memory_space<vmem>>, vector<32x128xf32>
    %c0_3 = arith.constant 0 : index
    %c0_4 = arith.constant 0 : index
    %2 = vector.load %arg3[%c0_3, %c0_4] : memref<1x128xf32, #tpu.memory_space<vmem>>, vector<1x128xf32>
    %c0_5 = arith.constant 0 : index
    %c0_6 = arith.constant 0 : index
    %3 = vector.load %arg4[%c0_5, %c0_6] : memref<128x128xf32, #tpu.memory_space<vmem>>, vector<128x128xf32>
    %c0_7 = arith.constant 0 : index
    %c0_8 = arith.constant 0 : index
    %4 = vector.load %arg5[%c0_7, %c0_8] : memref<1x128xf32, #tpu.memory_space<vmem>>, vector<1x128xf32>
    %c0_9 = arith.constant 0 : index
    %c0_10 = arith.constant 0 : index
    %5 = vector.load %arg6[%c0_9, %c0_10] : memref<1x128xf32, #tpu.memory_space<vmem>>, vector<1x128xf32>
    %c0_11 = arith.constant 0 : index
    %c0_12 = arith.constant 0 : index
    %6 = vector.load %arg7[%c0_11, %c0_12] : memref<1x1xf32, #tpu.memory_space<vmem>>, vector<1x1xf32>
    %cst = arith.constant dense<0.000000e+00> : vector<8x128xf32>
    %7 = tpu.matmul %0, %1, %cst {dimension_numbers = #tpu.dot_dimension_numbers<[1], [0], [0], [1], [0, 0, 1, 1], [], []>} : vector<8x32xf32>, vector<32x128xf32>, vector<8x128xf32> -> vector<8x128xf32>
    %8 = vector.broadcast %2 : vector<1x128xf32> to vector<8x128xf32>
    %9 = arith.addf %7, %8 : vector<8x128xf32>
    %cst_13 = arith.constant 5.000000e-01 : f32
    %10 = vector.broadcast %cst_13 : f32 to vector<8x128xf32>
    %11 = arith.mulf %10, %9 : vector<8x128xf32>
    %12 = math.tanh %11 : vector<8x128xf32>
    %cst_14 = arith.constant 1.000000e+00 : f32
    %13 = vector.broadcast %cst_14 : f32 to vector<8x128xf32>
    %14 = arith.addf %12, %13 : vector<8x128xf32>
    %cst_15 = arith.constant 5.000000e-01 : f32
    %15 = vector.broadcast %cst_15 : f32 to vector<8x128xf32>
    %16 = arith.mulf %15, %14 : vector<8x128xf32>
    %cst_16 = arith.constant dense<0.000000e+00> : vector<8x128xf32>
    %17 = tpu.matmul %16, %3, %cst_16 {dimension_numbers = #tpu.dot_dimension_numbers<[1], [0], [0], [1], [0, 0, 1, 1], [], []>} : vector<8x128xf32>, vector<128x128xf32>, vector<8x128xf32> -> vector<8x128xf32>
    %18 = vector.broadcast %4 : vector<1x128xf32> to vector<8x128xf32>
    %19 = arith.addf %17, %18 : vector<8x128xf32>
    %cst_17 = arith.constant 5.000000e-01 : f32
    %20 = vector.broadcast %cst_17 : f32 to vector<8x128xf32>
    %21 = arith.mulf %20, %19 : vector<8x128xf32>
    %22 = math.tanh %21 : vector<8x128xf32>
    %cst_18 = arith.constant 1.000000e+00 : f32
    %23 = vector.broadcast %cst_18 : f32 to vector<8x128xf32>
    %24 = arith.addf %22, %23 : vector<8x128xf32>
    %cst_19 = arith.constant 5.000000e-01 : f32
    %25 = vector.broadcast %cst_19 : f32 to vector<8x128xf32>
    %26 = arith.mulf %25, %24 : vector<8x128xf32>
    %27 = vector.broadcast %5 : vector<1x128xf32> to vector<8x128xf32>
    %28 = arith.mulf %26, %27 : vector<8x128xf32>
    %cst_20 = arith.constant dense<0.000000e+00> : vector<8xf32>
    %29 = vector.multi_reduction <add>, %28, %cst_20 [1] : vector<8x128xf32> to vector<8xf32>
    %30 = vector.shape_cast %29 : vector<8xf32> to vector<8x1xf32>
    %31 = vector.broadcast %6 : vector<1x1xf32> to vector<8x1xf32>
    %32 = arith.addf %30, %31 : vector<8x1xf32>
    %cst_21 = arith.constant 5.000000e-01 : f32
    %33 = vector.broadcast %cst_21 : f32 to vector<8x1xf32>
    %34 = arith.mulf %33, %32 : vector<8x1xf32>
    %35 = math.tanh %34 : vector<8x1xf32>
    %cst_22 = arith.constant 1.000000e+00 : f32
    %36 = vector.broadcast %cst_22 : f32 to vector<8x1xf32>
    %37 = arith.addf %35, %36 : vector<8x1xf32>
    %cst_23 = arith.constant 5.000000e-01 : f32
    %38 = vector.broadcast %cst_23 : f32 to vector<8x1xf32>
    %39 = arith.mulf %38, %37 : vector<8x1xf32>
    %c0_24 = arith.constant 0 : index
    %c0_25 = arith.constant 0 : index
    %40 = vector.load %arg8[%c0_24, %c0_25] : memref<8x1xf32, #tpu.memory_space<vmem>>, vector<8x1xf32>
    tpu.vector_store %arg8[%c0_24, %c0_25], %39 {strides = array<i32>} : memref<8x1xf32, #tpu.memory_space<vmem>>, vector<8x1xf32>,
    return
  }
  func.func @transform_0(%arg0: i32) -> (i32, i32) {
    %c0_i32 = arith.constant 0 : i32
    %c0_i32_0 = arith.constant 0 : i32
    return %arg0, %c0_i32 : i32, i32
  }
  func.func @transform_1(%arg0: i32) -> (i32, i32) {
    %c0_i32 = arith.constant 0 : i32
    %c0_i32_0 = arith.constant 0 : i32
    %c0_i32_1 = arith.constant 0 : i32
    return %c0_i32, %c0_i32_0 : i32, i32
  }
  func.func @transform_2(%arg0: i32) -> (i32, i32) {
    %c0_i32 = arith.constant 0 : i32
    %c0_i32_0 = arith.constant 0 : i32
    %c0_i32_1 = arith.constant 0 : i32
    return %c0_i32, %c0_i32_0 : i32, i32
  }
  func.func @transform_3(%arg0: i32) -> (i32, i32) {
    %c0_i32 = arith.constant 0 : i32
    %c0_i32_0 = arith.constant 0 : i32
    %c0_i32_1 = arith.constant 0 : i32
    return %c0_i32, %c0_i32_0 : i32, i32
  }
  func.func @transform_4(%arg0: i32) -> (i32, i32) {
    %c0_i32 = arith.constant 0 : i32
    %c0_i32_0 = arith.constant 0 : i32
    %c0_i32_1 = arith.constant 0 : i32
    return %c0_i32, %c0_i32_0 : i32, i32
  }
  func.func @transform_5(%arg0: i32) -> (i32, i32) {
    %c0_i32 = arith.constant 0 : i32
    %c0_i32_0 = arith.constant 0 : i32
    %c0_i32_1 = arith.constant 0 : i32
    return %c0_i32, %c0_i32_0 : i32, i32
  }
  func.func @transform_6(%arg0: i32) -> (i32, i32) {
    %c0_i32 = arith.constant 0 : i32
    %c0_i32_0 = arith.constant 0 : i32
    %c0_i32_1 = arith.constant 0 : i32
    return %c0_i32, %c0_i32_0 : i32, i32
  }
  func.func @transform_7(%arg0: i32) -> (i32, i32) {
    %c0_i32 = arith.constant 0 : i32
    %c0_i32_0 = arith.constant 0 : i32
    return %arg0, %c0_i32 : i32, i32
  }
}

</mosaic_0001>

<bundles_post_ra>
// kernel: tpu_custom_call.1
= control target key start
LH: loop header
LB: loop body
LE: loop exit
PB: predicated region body
PF: predicated region fallthrough
CT: control target
= control target key end

     0   :  { %s339_s0 = inlined_call_operand.hbm [shape: f32[8,32], index: 0, kind: input, shape index: {}]   ;;  %s340_s1 = inlined_call_operand.hbm [shape: f32[32,128], index: 1, kind: input, shape index: {}]   ;;  %s341_s2 = inlined_call_operand.vmem [shape: f32[1,128], index: 2, kind: input, shape index: {}]   ;;  %s342_s3 = inlined_call_operand.hbm [shape: f32[128,128], index: 3, kind: input, shape index: {}]   ;;  %s343_s4 = inlined_call_operand.vmem [shape: f32[1,128], index: 4, kind: input, shape index: {}]   ;;  %s344_s5 = inlined_call_operand.vmem [shape: f32[1,128], index: 5, kind: input, shape index: {}]   ;;  %s345_s6 = inlined_call_operand.<no memory space> [shape: f32[1,1], index: 6, kind: input, shape index: {}]   ;;  %s346_s7 = inlined_call_operand.vmem [shape: f32[8,1], index: 7, kind: output, shape index: {}]  }
   0x1   :  { %v12_v0 = vstv %s345_s6 }
   0x2   :  { %13 = vst [vmem:[#allocation2] sm:$0x1] %v12_v0 }
   0x3   :  { %14 = vsyncpa [#allocation4], 0 }
   0x4   :  { %15 = vsyncpa [#allocation6], 0  ;;  %s31_s28 = sshll.u32 %s340_s1, 4  ;;  %s270_s29 = smov [#allocation5]   ;;  %s32_s28 = int_to_ptr.hbm [resolvable:$true] %s31_s28 }
   0x5   :  { %s33_s30 = sshll.u32 %s270_s29, 4  ;;  %s21_s10 = sshll.u32 %s339_s0, 4  ;;  %s34_s30 = int_to_ptr.vmem [resolvable:$true] %s33_s30  ;;  %s22_s10 = int_to_ptr.hbm [resolvable:$true] %s21_s10 }
   0x6   :  { %s271_s11 = smov 128   ;;  %s272_s12 = smov 8  }
   0x7   :  { %39 = dma.hbm_to_vmem [thread:$0]  %s32_s28, 512, %s34_s30, [#allocation6], %s271_s11, %s271_s11, %s272_s12  }
   0x8   :  { %s273_s6 = smov [#allocation3]   ;;  %s46_s16 = sshll.u32 %s342_s3, 4  ;;  %s47_s16 = int_to_ptr.hbm [resolvable:$true] %s46_s16 }
   0x9   :  { %s23_s13 = sshll.u32 %s273_s6, 4  ;;  %s274_s1 = smov [#allocation7]   ;;  %s24_s13 = int_to_ptr.vmem [resolvable:$true] %s23_s13 }
   0xa   :  { %26 = dma.hbm_to_vmem [thread:$0]  %s22_s10, 128, %s24_s13, [#allocation4]  }
   0xb   :  { %s48_s17 = sshll.u32 %s274_s1, 4  ;;  %s49_s17 = int_to_ptr.vmem [resolvable:$true] %s48_s17 }
   0xc   :  { %54 = dma.hbm_to_vmem [thread:$0]  %s47_s16, 2048, %s49_s17, [#allocation6], %s271_s11, %s271_s11, %s272_s12  }
   0xd   :  { %266 = dma.done.wait [#allocation4], 128  }
   0xe   :  { %267 = vsyncadd [#allocation4], 4294967168 }
   0xf   :  { %268 = dma.done.wait [#allocation6], 2560  }
  0x10   :  { %269 = vsyncadd [#allocation6], 4294964736  ;;  %v77_v1 = vld [vmem:[#allocation5 + $0x18] sm:$0xff]  ;;  %v76_v2 = vld [vmem:[#allocation5 + $0x10] sm:$0xff]  ;;  %vm101_vm0 = vcmask 261120   ;;  %vm170_vm1 = vcmask 7168  }
  0x11   :  { %117 = vmatpush.msra.mxu0 %v77_v1  ;;  %v94_v3 = vld [vmem:[#allocation7 + $0x78] sm:$0xff]  ;;  %v75_v4 = vld [vmem:[#allocation5 + $0x8] sm:$0xff]  ;;  %v93_v5 = vld [vmem:[#allocation7 + $0x70] sm:$0xff] }
  0x12   :  { %132 = vmatpush.msra.mxu1 %v94_v3  ;;  %v74_v6 = vld [vmem:[#allocation5] sm:$0xff]  ;;  %v92_v7 = vld [vmem:[#allocation7 + $0x68] sm:$0xff]  ;;  %v73_v8 = vld [vmem:[#allocation3] sm:$0xff] }
  0x13   :  { %118 = vmatpush.msra.mxu0 %v76_v2  ;;  %v91_v9 = vld [vmem:[#allocation7 + $0x60] sm:$0xff]  ;;  %v90_v10 = vld [vmem:[#allocation7 + $0x58] sm:$0xff]  ;;  %v89_v11 = vld [vmem:[#allocation7 + $0x50] sm:$0xff] }
  0x14   :  { %133 = vmatpush.msra.mxu1 %v93_v5  ;;  %v88_v12 = vld [vmem:[#allocation7 + $0x48] sm:$0xff]  ;;  %v87_v13 = vld [vmem:[#allocation7 + $0x40] sm:$0xff]  ;;  %v86_v14 = vld [vmem:[#allocation7 + $0x38] sm:$0xff] }
  0x15   :  { %119 = vmatpush.msra.mxu0 %v75_v4  ;;  %v85_v15 = vld [vmem:[#allocation7 + $0x30] sm:$0xff]  ;;  %v84_v16 = vld [vmem:[#allocation7 + $0x28] sm:$0xff]  ;;  %v83_v17 = vld [vmem:[#allocation7 + $0x20] sm:$0xff] }
  0x16   :  { %134 = vmatpush.msra.mxu1 %v92_v7  ;;  %v82_v18 = vld [vmem:[#allocation7 + $0x18] sm:$0xff]  ;;  %v81_v19 = vld [vmem:[#allocation7 + $0x10] sm:$0xff]  ;;  %v80_v20 = vld [vmem:[#allocation7 + $0x8] sm:$0xff] }
  0x17   :  { %120 = vmatpush.msra.mxu0 %v74_v6  ;;  %v79_v21 = vld [vmem:[#allocation7] sm:$0xff]  ;;  %v184_v22 = vld [vmem:[%s341_s2] ss:$0 sm:$0xff] }
  0x18   :  { %178 = vmatmul.msk.f32.vlgmr.msra.gmra.mxu0 %vm101_vm0, %v73_v8  ;;  %135 = vmatpush.msra.mxu1 %v91_v9  ;;  %v185_v29 = vld [vmem:[%s343_s4] ss:$0 sm:$0xff] }
  0x19   :  { %v186_v35 = vld [vmem:[%s344_s5] ss:$0 sm:$0xff] }
  0x1a   :  { %136 = vmatpush.msra.mxu1 %v90_v10  ;;  %v187_v38 = vld [vmem:[#allocation2] ss:$0 sm:$0xff] }
  0x1c   :  { %137 = vmatpush.msra.mxu1 %v89_v11 }
  0x1e   :  { %138 = vmatpush.msra.mxu1 %v88_v12 }
  0x20   :  { %139 = vmatpush.msra.mxu1 %v87_v13 }
  0x22   :  { %140 = vmatpush.msra.mxu1 %v86_v14 }
  0x24   :  { %141 = vmatpush.msra.mxu1 %v85_v15 }
  0x26   :  { %142 = vmatpush.msra.mxu1 %v84_v16 }
  0x28   :  { %143 = vmatpush.msra.mxu1 %v83_v17 }
  0x2a   :  { %144 = vmatpush.msra.mxu1 %v82_v18 }
  0x2c   :  { %145 = vmatpush.msra.mxu1 %v81_v19 }
  0x2e   :  { %146 = vmatpush.msra.mxu1 %v80_v20 }
  0x30   :  { %147 = vmatpush.msra.mxu1 %v79_v21 }
  0x95   :  { %v122_v23 = vpop.f32.mrf.mxu0 }
  0x96   :  { %v123_v24 = vadd.f32 %v184_v22, %v122_v23 }
  0x98   :  { %v125_v25 = vmul.f32 0.5, %v123_v24 }
  0x9a   :  { %188 = vtanh.f32 %v125_v25 }
  0xa0   :  { %v189_v26 = vpop.eup %188 }
  0xa1   :  { %v127_v27 = vadd.f32 1.0, %v189_v26 }
  0xa3   :  { %v128_v28 = vmul.f32 0.5, %v127_v27 }
  0xa5   :  { %148 = vmatmul.f32.vlgmr.msra.gmra.mxu1 %v128_v28 }
 0x122   :  { %v149_v30 = vpop.f32.mrf.mxu1 }
 0x123   :  { %v150_v31 = vadd.f32 %v185_v29, %v149_v30 }
 0x125   :  { %v152_v32 = vmul.f32 0.5, %v150_v31 }
 0x127   :  { %190 = vtanh.f32 %v152_v32 }
 0x12d   :  { %v191_v33 = vpop.eup %190 }
 0x12e   :  { %v154_v34 = vadd.f32 1.0, %v191_v33 }
 0x130   :  { %v155_v36 = vmul.f32 0.5, %v154_v34 }
 0x132   :  { %v159_v37 = vmul.f32 %v186_v35, %v155_v36 }
 0x134   :  { %160 = vadd.xlane.f32.xlu0 %v159_v37 }
 0x1a7   :  { %v161_v39 = vpop.xlane.xlu0 %160 }
 0x1a8   :  { %v165_v40 = vadd.f32 %v187_v38, %v161_v39 }
 0x1aa   :  { %v166_v41 = vmul.f32 0.5, %v165_v40 }
 0x1ac   :  { %192 = vtanh.f32 %v166_v41 }
 0x1b2   :  { %v193_v42 = vpop.eup %192 }
 0x1b3   :  { %v168_v43 = vadd.f32 1.0, %v193_v42 }
 0x1b5   :  { %v169_v44 = vmul.f32 0.5, %v168_v43 }
 0x1b7   :  { %171 = vst.msk [vmem:[%s346_s7] sm:$0xff] %vm170_vm1, %v169_v44 }
 0x1b8   :  { %176 = vsyncpa [#allocation4], 1 }
 0x1b9   :  { %177 = vsyncpa [#allocation6], 1 }

</bundles_post_ra>
